<compile_context>
chip_gen: v7x
topology: tpu7x:2x2x1
jax: 0.10.0
libtpu: 0.0.40
codegen_flags: <defaults>
</compile_context>

<pallas_src>
import jax
import jax.numpy as jnp
import numpy as np
from jax.experimental import pallas as pl
from jax.experimental.pallas import tpu as pltpu

# ---------------------------------------------------------------------------
# Problem sizes (small, consistent with the module's forward)
# ---------------------------------------------------------------------------
N_NODES = 8          # number of graph nodes
N_EDGES = 16         # number of directed edges
F_NODE = 4           # num_features_nodes
F_EDGE = 3           # num_features_edges
C_OUT = 2            # out_channels_node_features == out_channels_message == 2

LANE = 128           # TPU lane width
FN_PAD = LANE        # packed feature lanes: [x | ea | x_self] = 4+3+4 = 11 -> 128
C_PAD = LANE         # lane-dense output / weight columns
TILE_N = 8           # node tile (sublane aligned); grid axis is 'parallel'

NE2 = 2 * N_NODES + N_EDGES                        # packed LHS rows: [x ; ea ; x]
NE2_PAD = ((NE2 + LANE - 1) // LANE) * LANE        # lane/sublane-safe padding -> 128


# ---------------------------------------------------------------------------
# Pallas kernel: fused Edge_GCNConv + log_softmax for one node tile.
# Exactly two MXU matmuls; all elementwise math stays f32 (v5e-safe VPU/EUP).
# ---------------------------------------------------------------------------
def _edge_gcn_kernel(feat_ref, agg_ref, w_ref, bias_ref, o_ref):
    # (1) Aggregate raw packed features onto this node tile:
    #     aggmat = [adj | scatter | I], feat = [x ; ea ; x_self].
    #     bf16 MXU operands, f32 accumulation (counts are bf16-exact).
    agg_feat = jnp.dot(agg_ref[...].astype(jnp.bfloat16), feat_ref[...],
                       preferred_element_type=jnp.float32)        # (TILE_N, FN_PAD)

    # (2) Single packed projection: [W_msg_node ; W_msg_edge ; W_node].
    logits = jnp.dot(agg_feat.astype(jnp.bfloat16), w_ref[...],
                     preferred_element_type=jnp.float32) + bias_ref[...]

    # Log-softmax. The pad-lane mask is folded into the bias (-1e30), so no
    # iota/compare/where here; pad lanes contribute exp(-huge) == 0.
    m = jnp.max(logits, axis=1, keepdims=True)
    e = jnp.exp(logits - m)
    lse = jnp.log(jnp.sum(e, axis=1, keepdims=True)) + m
    o_ref[...] = logits - lse


def _edge_gcn_pallas(feat, aggmat, w_packed, bias_p):
    n = aggmat.shape[0]
    grid_n = n // TILE_N
    return pl.pallas_call(
        _edge_gcn_kernel,
        out_shape=jax.ShapeDtypeStruct((n, C_PAD), jnp.float32),
        grid=(grid_n,),
        in_specs=[
            pl.BlockSpec((NE2_PAD, FN_PAD), lambda i: (0, 0)),   # packed features (full)
            pl.BlockSpec((TILE_N, NE2_PAD), lambda i: (i, 0)),   # [adj|scatter|I] rows
            pl.BlockSpec((FN_PAD, C_PAD), lambda i: (0, 0)),     # packed weights
            pl.BlockSpec((TILE_N, C_PAD), lambda i: (i, 0)),     # folded bias + mask
        ],
        out_specs=pl.BlockSpec((TILE_N, C_PAD), lambda i: (i, 0)),
        compiler_params=pltpu.CompilerParams(
            dimension_semantics=("parallel",)),
    )(feat, aggmat, w_packed, bias_p)


# ---------------------------------------------------------------------------
# Per-call (hot-path) wrapper: only packs the dynamic inputs, then Pallas.
# ---------------------------------------------------------------------------
def _pack_features(x, edge_attr):
    """Pack x / edge_attr / x_self into one bf16 LHS slab at disjoint lanes."""
    n, e = x.shape[0], edge_attr.shape[0]
    feat = jnp.zeros((NE2_PAD, FN_PAD), jnp.float32)
    feat = feat.at[:n, :F_NODE].set(x)
    feat = feat.at[n:n + e, F_NODE:F_NODE + F_EDGE].set(edge_attr)
    feat = feat.at[n + e:n + e + n,
                   F_NODE + F_EDGE:F_NODE + F_EDGE + F_NODE].set(x)
    return feat.astype(jnp.bfloat16)


@jax.jit
def model_message_forward(x, edge_attr, aggmat, w_packed, bias_p):
    """log_softmax(Edge_GCNConv(x, edge_attr, edge_index)) — Pallas-backed."""
    feat = _pack_features(x, edge_attr)
    out_p = _edge_gcn_pallas(feat, aggmat, w_packed, bias_p)
    return out_p[:, :C_OUT]


# ---------------------------------------------------------------------------
# One-time (module-init style) precompute: graph structure + packed params.
# ---------------------------------------------------------------------------
def prepare_graph(edge_index, num_nodes):
    src, dst = edge_index[0], edge_index[1]
    gather = jax.nn.one_hot(src, num_nodes, dtype=jnp.float32)       # (E, N)
    scatter = jax.nn.one_hot(dst, num_nodes, dtype=jnp.float32).T    # (N, E)
    adj = scatter @ gather                                           # (N, N) in-edge counts
    deg = jnp.sum(scatter, axis=1)                                   # (N,)
    eye = jnp.eye(num_nodes, dtype=jnp.float32)
    aggmat = jnp.concatenate([adj, scatter, eye], axis=1)            # (N, 2N+E)
    aggmat = jnp.pad(aggmat, ((0, 0), (0, NE2_PAD - aggmat.shape[1])))
    # Kept f32 in HBM; cast to bf16 in-kernel (entries are exact small ints).
    return aggmat, deg


def prepare_params(params, deg):
    w = jnp.zeros((FN_PAD, C_PAD), jnp.float32)
    w = w.at[:F_NODE, :C_OUT].set(params["w_msg_node"])
    w = w.at[F_NODE:F_NODE + F_EDGE, :C_OUT].set(params["w_msg_edge"])
    w = w.at[F_NODE + F_EDGE:F_NODE + F_EDGE + F_NODE, :C_OUT].set(params["w_node"])
    w_packed = w.astype(jnp.bfloat16)
    # Folded bias: b_node + deg[n] * b_msg in f32; class mask folded in as
    # -1e30 on pad lanes so the kernel needs no mask construction.
    bias = params["b_node"][None, :] + deg[:, None] * params["b_msg"][None, :]
    bias_p = jnp.full((deg.shape[0], C_PAD), -1e30, jnp.float32)
    bias_p = bias_p.at[:, :C_OUT].set(bias)
    return w_packed, bias_p


# ---------------------------------------------------------------------------
# Deterministic parameter init (shapes from Edge_GCNConv(__init__) semantics)
# ---------------------------------------------------------------------------
def make_params(key):
    k1, k2, k3, k4, k5 = jax.random.split(key, 5)
    scale = 0.1
    return {
        "w_node": scale * jax.random.normal(k1, (F_NODE, C_OUT), jnp.float32),
        "b_node": scale * jax.random.normal(k2, (C_OUT,), jnp.float32),
        "w_msg_node": scale * jax.random.normal(k3, (F_NODE, C_OUT), jnp.float32),
        "w_msg_edge": scale * jax.random.normal(k4, (F_EDGE, C_OUT), jnp.float32),
        "b_msg": scale * jax.random.normal(k5, (C_OUT,), jnp.float32),
    }


# ---------------------------------------------------------------------------
# Pure-JAX references (no Pallas) for correctness checks
# ---------------------------------------------------------------------------
def kernel_math_reference(x, edge_attr, aggmat, w_packed, bias_p):
    """Mirrors the kernel's exact math (bf16 leaves + bf16 intermediates)."""
    feat = _pack_features(x, edge_attr)
    agg_feat = jnp.dot(aggmat.astype(jnp.bfloat16), feat,
                       preferred_element_type=jnp.float32)
    logits = jnp.dot(agg_feat.astype(jnp.bfloat16), w_packed,
                     preferred_element_type=jnp.float32) + bias_p
    return jax.nn.log_softmax(logits, axis=1)[:, :C_OUT]


def reference_forward(x, edge_attr, edge_index, params):
    """Full-f32 module semantics: msg -> scatter-sum -> node linear -> log_softmax."""
    src, dst = edge_index[0], edge_index[1]
    msg = (x[src] @ params["w_msg_node"]
           + edge_attr @ params["w_msg_edge"]
           + params["b_msg"])                                        # (E, C)
    agg = jax.ops.segment_sum(msg, dst, num_segments=x.shape[0])
    logits = x @ params["w_node"] + params["b_node"] + agg
    return jax.nn.log_softmax(logits, axis=1)


if __name__ == "__main__":
    assert N_NODES % TILE_N == 0
    assert F_NODE + F_EDGE + F_NODE <= FN_PAD

    key = jax.random.PRNGKey(0)
    k_x, k_ea, k_src, k_dst, k_params = jax.random.split(key, 5)

    x = jax.random.normal(k_x, (N_NODES, F_NODE), jnp.float32)
    edge_attr = jax.random.normal(k_ea, (N_EDGES, F_EDGE), jnp.float32)
    src = jax.random.randint(k_src, (N_EDGES,), 0, N_NODES, jnp.int32)
    dst = jax.random.randint(k_dst, (N_EDGES,), 0, N_NODES, jnp.int32)
    edge_index = jnp.stack([src, dst], axis=0)               # (2, E)

    params = make_params(k_params)

    # one-time precompute (outside the hot path)
    aggmat, deg = prepare_graph(edge_index, N_NODES)
    w_packed, bias_p = prepare_params(params, deg)

    out = model_message_forward(x, edge_attr, aggmat, w_packed, bias_p)
    out = jax.block_until_ready(out)
    out_np = np.asarray(out)

    # Tight check: pure-JAX emulation of the exact kernel math (same bf16
    # operands / intermediates), only accumulation-order differences remain.
    ref_tight = np.asarray(kernel_math_reference(x, edge_attr, aggmat,
                                                 w_packed, bias_p))
    np.testing.assert_allclose(out_np, ref_tight, rtol=1e-4, atol=1e-4)

    # Loose sanity check vs. full-f32 module semantics (bf16 quantization).
    ref_f32 = np.asarray(reference_forward(x, edge_attr, edge_index, params))
    np.testing.assert_allclose(out_np, ref_f32, rtol=5e-2, atol=5e-2)

    # log_softmax sanity: each row's probabilities sum to 1.
    np.testing.assert_allclose(np.exp(out_np).sum(axis=1),
                               np.ones(N_NODES), rtol=1e-5, atol=1e-5)

    print("KERNEL_OK")
</pallas_src>

<mosaic_0001>
module attributes {stable_mosaic.version = 11 : i64} {
  func.func @_edge_gcn_kernel(%arg0: i32, %arg1: memref<128x128xbf16, #tpu.memory_space<vmem>>, %arg2: memref<8x128xf32, #tpu.memory_space<vmem>>, %arg3: memref<128x128xbf16, #tpu.memory_space<vmem>>, %arg4: memref<8x128xf32, #tpu.memory_space<vmem>>, %arg5: memref<8x128xf32, #tpu.memory_space<vmem>>) attributes {dimension_semantics = [#tpu.dimension_semantics<parallel>], iteration_bounds = array<i64: 1>, scalar_prefetch = 0 : i64, scratch_operands = 0 : i64, tpu.core_type = #tpu.core_type<tc>, window_params = [{pipeline_mode = #tpu.pipeline_mode<synchronous>, transform_indices = @transform_0, window_bounds = array<i64: 128, 128>}, {transform_indices = @transform_1, window_bounds = array<i64: 8, 128>}, {pipeline_mode = #tpu.pipeline_mode<synchronous>, transform_indices = @transform_2, window_bounds = array<i64: 128, 128>}, {transform_indices = @transform_3, window_bounds = array<i64: 8, 128>}, {transform_indices = @transform_4, window_bounds = array<i64: 8, 128>}]} {
    %c0 = arith.constant 0 : index
    %c0_0 = arith.constant 0 : index
    %0 = vector.load %arg2[%c0, %c0_0] : memref<8x128xf32, #tpu.memory_space<vmem>>, vector<8x128xf32>
    %1 = arith.truncf %0 : vector<8x128xf32> to vector<8x128xbf16>
    %c0_1 = arith.constant 0 : index
    %c0_2 = arith.constant 0 : index
    %2 = vector.load %arg1[%c0_1, %c0_2] : memref<128x128xbf16, #tpu.memory_space<vmem>>, vector<128x128xbf16>
    %cst = arith.constant dense<0.000000e+00> : vector<8x128xf32>
    %3 = tpu.matmul %1, %2, %cst {dimension_numbers = #tpu.dot_dimension_numbers<[1], [0], [0], [1], [0, 0, 1, 1], [], []>} : vector<8x128xbf16>, vector<128x128xbf16>, vector<8x128xf32> -> vector<8x128xf32>
    %4 = arith.truncf %3 : vector<8x128xf32> to vector<8x128xbf16>
    %c0_3 = arith.constant 0 : index
    %c0_4 = arith.constant 0 : index
    %5 = vector.load %arg3[%c0_3, %c0_4] : memref<128x128xbf16, #tpu.memory_space<vmem>>, vector<128x128xbf16>
    %cst_5 = arith.constant dense<0.000000e+00> : vector<8x128xf32>
    %6 = tpu.matmul %4, %5, %cst_5 {dimension_numbers = #tpu.dot_dimension_numbers<[1], [0], [0], [1], [0, 0, 1, 1], [], []>} : vector<8x128xbf16>, vector<128x128xbf16>, vector<8x128xf32> -> vector<8x128xf32>
    %c0_6 = arith.constant 0 : index
    %c0_7 = arith.constant 0 : index
    %7 = vector.load %arg4[%c0_6, %c0_7] : memref<8x128xf32, #tpu.memory_space<vmem>>, vector<8x128xf32>
    %8 = arith.addf %6, %7 : vector<8x128xf32>
    %cst_8 = arith.constant dense<0xFF800000> : vector<8xf32>
    %9 = vector.multi_reduction <maximumf>, %8, %cst_8 [1] : vector<8x128xf32> to vector<8xf32>
    %10 = vector.shape_cast %9 : vector<8xf32> to vector<8x1xf32>
    %11 = vector.broadcast %10 : vector<8x1xf32> to vector<8x128xf32>
    %12 = arith.subf %8, %11 : vector<8x128xf32>
    %13 = math.exp %12 : vector<8x128xf32>
    %cst_9 = arith.constant dense<0.000000e+00> : vector<8xf32>
    %14 = vector.multi_reduction <add>, %13, %cst_9 [1] : vector<8x128xf32> to vector<8xf32>
    %15 = vector.shape_cast %14 : vector<8xf32> to vector<8x1xf32>
    %16 = math.log %15 : vector<8x1xf32>
    %17 = arith.addf %16, %10 : vector<8x1xf32>
    %18 = vector.broadcast %17 : vector<8x1xf32> to vector<8x128xf32>
    %19 = arith.subf %8, %18 : vector<8x128xf32>
    %c0_10 = arith.constant 0 : index
    %c0_11 = arith.constant 0 : index
    %20 = vector.load %arg5[%c0_10, %c0_11] : memref<8x128xf32, #tpu.memory_space<vmem>>, vector<8x128xf32>
    tpu.vector_store %arg5[%c0_10, %c0_11], %19 {strides = array<i32>} : memref<8x128xf32, #tpu.memory_space<vmem>>, vector<8x128xf32>,
    return
  }
  func.func @transform_0(%arg0: i32) -> (i32, i32) {
    %c0_i32 = arith.constant 0 : i32
    %c0_i32_0 = arith.constant 0 : i32
    %c0_i32_1 = arith.constant 0 : i32
    return %c0_i32, %c0_i32_0 : i32, i32
  }
  func.func @transform_1(%arg0: i32) -> (i32, i32) {
    %c0_i32 = arith.constant 0 : i32
    %c0_i32_0 = arith.constant 0 : i32
    return %arg0, %c0_i32 : i32, i32
  }
  func.func @transform_2(%arg0: i32) -> (i32, i32) {
    %c0_i32 = arith.constant 0 : i32
    %c0_i32_0 = arith.constant 0 : i32
    %c0_i32_1 = arith.constant 0 : i32
    return %c0_i32, %c0_i32_0 : i32, i32
  }
  func.func @transform_3(%arg0: i32) -> (i32, i32) {
    %c0_i32 = arith.constant 0 : i32
    %c0_i32_0 = arith.constant 0 : i32
    return %arg0, %c0_i32 : i32, i32
  }
  func.func @transform_4(%arg0: i32) -> (i32, i32) {
    %c0_i32 = arith.constant 0 : i32
    %c0_i32_0 = arith.constant 0 : i32
    return %arg0, %c0_i32 : i32, i32
  }
}

</mosaic_0001>

<bundles_post_ra>
// kernel: model_message_forward.1
= control target key start
LH: loop header
LB: loop body
LE: loop exit
PB: predicated region body
PF: predicated region fallthrough
CT: control target
= control target key end

     0   :  { %v342_v0 = vmov 0.0   ;;  %vm343_vm0 = vmmov 0   ;;  %s426_s0 = inlined_call_operand.vmem [shape: bf16[128,128], index: 0, kind: input, shape index: {}]   ;;  %s427_s2 = inlined_call_operand.vmem [shape: bf16[128,128], index: 2, kind: input, shape index: {}]   ;;  %s428_s1 = inlined_call_operand.vmem [shape: f32[8,128], index: 1, kind: input, shape index: {}]   ;;  %s429_s3 = inlined_call_operand.vmem [shape: f32[8,128], index: 3, kind: input, shape index: {}]   ;;  %s430_s4 = inlined_call_operand.vmem [shape: f32[8,128], index: 4, kind: output, shape index: {}]  }
   0x1   :  { %280 = vmatprep.subr.bf16.mxu0 %v342_v0  ;;  %v322_v1 = vld [vmem:[%s426_s0] sm:$0xff]   ;;  %296 = vmatprep.mubr.msk.bf16.mxu0 %vm343_vm0, %v342_v0  ;;  %v323_v2 = vld [vmem:[%s426_s0 + $0x8] sm:$0xff]   ;;  %v324_v3 = vld [vmem:[%s426_s0 + $0x10] sm:$0xff]  }
   0x2   :  { %300 = vmatprep.subr.bf16.mxu1 %v342_v0  ;;  %316 = vmatprep.mubr.msk.bf16.mxu1 %vm343_vm0, %v342_v0  ;;  %v330_v4 = vld [vmem:[%s427_s2] sm:$0xff]   ;;  %v325_v5 = vld [vmem:[%s426_s0 + $0x18] sm:$0xff]   ;;  %v331_v6 = vld [vmem:[%s427_s2 + $0x8] sm:$0xff]  }
   0x3   :  { %281 = vmatpush3.bf16.msra.mxu0 %v322_v1  ;;  %301 = vmatpush3.bf16.msra.mxu1 %v330_v4  ;;  %v326_v7 = vld [vmem:[%s426_s0 + $0x20] sm:$0xff]   ;;  %v332_v8 = vld [vmem:[%s427_s2 + $0x10] sm:$0xff]   ;;  %v327_v9 = vld [vmem:[%s426_s0 + $0x28] sm:$0xff]  }
   0x4   :  { %282 = vmatprep.subr.bf16.mxu0 %v342_v0  ;;  %302 = vmatprep.subr.bf16.mxu1 %v342_v0  ;;  %v333_v10 = vld [vmem:[%s427_s2 + $0x18] sm:$0xff]   ;;  %v328_v11 = vld [vmem:[%s426_s0 + $0x30] sm:$0xff]   ;;  %v334_v12 = vld [vmem:[%s427_s2 + $0x20] sm:$0xff]  }
   0x5   :  { %v329_v13 = vld [vmem:[%s426_s0 + $0x38] sm:$0xff]   ;;  %v18_v14 = vld [vmem:[%s428_s1] sm:$0xff]  ;;  %v335_v15 = vld [vmem:[%s427_s2 + $0x28] sm:$0xff]  }
   0x6   :  { %v19_v16 = vpack.c.bf16 %v18_v14, %v18_v14  ;;  %v336_v17 = vld [vmem:[%s427_s2 + $0x30] sm:$0xff]   ;;  %v337_v18 = vld [vmem:[%s427_s2 + $0x38] sm:$0xff]   ;;  %v141_v24 = vld [vmem:[%s429_s3] sm:$0xff] }
   0x7   :  { %283 = vmatpush3.bf16.msra.mxu0 %v323_v2  ;;  %303 = vmatpush3.bf16.msra.mxu1 %v331_v6 }
   0x8   :  { %284 = vmatprep.subr.bf16.mxu0 %v342_v0  ;;  %304 = vmatprep.subr.bf16.mxu1 %v342_v0 }
   0xb   :  { %285 = vmatpush3.bf16.msra.mxu0 %v324_v3  ;;  %305 = vmatpush3.bf16.msra.mxu1 %v332_v8 }
   0xc   :  { %286 = vmatprep.subr.bf16.mxu0 %v342_v0  ;;  %306 = vmatprep.subr.bf16.mxu1 %v342_v0 }
   0xf   :  { %287 = vmatpush3.bf16.msra.mxu0 %v325_v5  ;;  %307 = vmatpush3.bf16.msra.mxu1 %v333_v10 }
  0x10   :  { %288 = vmatprep.subr.bf16.mxu0 %v342_v0  ;;  %308 = vmatprep.subr.bf16.mxu1 %v342_v0 }
  0x13   :  { %289 = vmatpush3.bf16.msra.mxu0 %v326_v7  ;;  %309 = vmatpush3.bf16.msra.mxu1 %v334_v12 }
  0x14   :  { %290 = vmatprep.subr.bf16.mxu0 %v342_v0  ;;  %310 = vmatprep.subr.bf16.mxu1 %v342_v0 }
  0x17   :  { %291 = vmatpush3.bf16.msra.mxu0 %v327_v9  ;;  %311 = vmatpush3.bf16.msra.mxu1 %v335_v15 }
  0x18   :  { %292 = vmatprep.subr.bf16.mxu0 %v342_v0  ;;  %312 = vmatprep.subr.bf16.mxu1 %v342_v0 }
  0x1b   :  { %293 = vmatpush3.bf16.msra.mxu0 %v328_v11  ;;  %313 = vmatpush3.bf16.msra.mxu1 %v336_v17 }
  0x1c   :  { %294 = vmatprep.subr.bf16.mxu0 %v342_v0  ;;  %314 = vmatprep.subr.bf16.mxu1 %v342_v0 }
  0x1f   :  { %295 = vmatpush3.bf16.msra.mxu0 %v329_v13  ;;  %315 = vmatpush3.bf16.msra.mxu1 %v337_v18 }
  0x22   :  { %297 = vmatmul.mubr.bf16.vlgmr.msra.gmra.mrb[0].mxu0 %v19_v16 }
  0xf5   :  { %v118_v19 = vpop.f32.mrb[0].mxu0 }
  0xf6   :  { %v124_v20 = vpack.c.bf16 %v118_v19, %v118_v19  ;;  %v298_v21 = vpop.f32.mrb[1].mxu0 }
  0xf7   :  { %v121_v22 = vpop.f32.mrb[2].mxu0 }
  0xf8   :  { %v299_v23 = vpop.f32.mrb[3].mxu0  ;;  %317 = vmatmul.mubr.bf16.vlgmr.msra.gmra.mrb[0].mxu1 %v124_v20 }
 0x1cb   :  { %v224_v25 = vpop.f32.mrb[0].mxu1 }
 0x1cc   :  { %v225_v26 = vadd.f32 %v224_v25, %v141_v24  ;;  %v318_v27 = vpop.f32.mrb[1].mxu1 }
 0x1cd   :  { %v227_v28 = vpop.f32.mrb[2].mxu1 }
 0x1ce   :  { %230 = vmax.xlane.f32.xlu0 %v225_v26  ;;  %v319_v29 = vpop.f32.mrb[3].mxu1 }
 0x25b   :  { %v231_v30 = vpop.xlane.xlu0 %230 }
 0x25c   :  { %v232_v31 = vsub.f32 %v225_v26, %v231_v30 }
 0x25e   :  { %v233_v32 = vmul.f32 1.442695, %v232_v31 }
 0x260   :  { %338 = vpow2.f32 %v233_v32 }
 0x26a   :  { %v339_v33 = vpop.eup %338 }
 0x26b   :  { %235 = vadd.xlane.f32.xlu0 %v339_v33 }
 0x2f8   :  { %v236_v34 = vpop.xlane.xlu0 %235 }
 0x2f9   :  { %340 = vlog2.f32 %v236_v34 }
 0x303   :  { %v341_v35 = vpop.eup %340 }
 0x304   :  { %v238_v36 = vmul.f32 0.6931472, %v341_v35 }
 0x306   :  { %v239_v37 = vadd.f32 %v238_v36, %v231_v30 }
 0x308   :  { %v240_v38 = vsub.f32 %v225_v26, %v239_v37 }
 0x30a   :  { %241 = vst [vmem:[%s430_s4] sm:$0xff] %v240_v38 }

</bundles_post_ra>
